<compile_context>
chip_gen: v6e
topology: v6e:2x2x1
jax: 0.10.0
libtpu: 0.0.40
codegen_flags: <defaults>
</compile_context>

<pallas_src>
import functools

import jax
import jax.numpy as jnp
from jax.experimental import pallas as pl
from jax.experimental.pallas import tpu as pltpu


def _scatter_kernel(start_ref, nwin_ref, idx_ref, feat_ref, out_ref, *, k_win):
    # Scalar prefetch (SMEM):
    #   start_ref[i] : K_WIN-aligned offset of the first window of tile i's run
    #   nwin_ref[i]  : number of K_WIN windows spanned by tile i's run (0 = empty)
    # Resident VMEM inputs (constant block index -> fetched once):
    #   idx_ref  : [n_pad, 1]  destination columns of the sorted points (int32)
    #   feat_ref : [n_pad, C]  sorted pillar features (compute dtype)
    # Output (VMEM):
    #   out_ref  : [C, TM]     lane-dense tile of the BEV canvas
    i = pl.program_id(0)
    _, tm = out_ref.shape

    # Most of the canvas is empty: always zero-fill, only compute when needed.
    out_ref[...] = jnp.zeros_like(out_ref)

    nwin = nwin_ref[i]

    @pl.when(nwin > 0)
    def _():
        # Column ids covered by this tile, built once per grid step and reused
        # by every window (JAX does not CSE broadcast_in_dim -> hoist).
        col_ids = i * tm + jax.lax.broadcasted_iota(jnp.int32, (1, tm), 1)  # [1, TM]
        base = start_ref[i]

        @pl.loop(0, nwin)
        def _(w):
            off = pl.multiple_of(base + w * k_win, k_win)
            idx_win = idx_ref[pl.ds(off, k_win), :]             # [K, 1] int32
            feat_win = feat_ref[pl.ds(off, k_win), :]           # [K, C]
            # mask[k, t] = 1 iff sorted point (off + k) targets column i*TM + t.
            # Sentinel-padded points and points of other tiles never match
            # (and padded features are zero anyway).
            mask = (idx_win == col_ids).astype(feat_win.dtype)  # [K, TM]
            # (K, C) x (K, TM) contracted over K -> [C, TM]; f32 MXU accumulate.
            out_ref[...] += jax.lax.dot_general(
                feat_win, mask,
                dimension_numbers=(((0,), (0,)), ((), ())),
                preferred_element_type=jnp.float32,
            ).astype(out_ref.dtype)


def point_pillar_scatter(pillar_features, coords, nx, ny, nz=1, *,
                         tm=512, k_win=256, compute_dtype=None):
    """Pallas TPU equivalent of PointPillarScatter.forward -> [1, C*nz, ny, nx].

    compute_dtype: dtype of the mask / feature windows fed to the MXU
      (accumulation is always f32).  Default = pillar_features.dtype, i.e.
      bit-exact vs. the reference; jnp.bfloat16 gives ~2-3x MXU throughput on
      v5e/v6e/v7x at the cost of bf16-rounding the scattered feature values.
    """
    assert nz == 1
    assert tm % 128 == 0 and k_win % 128 == 0
    N, C = pillar_features.shape
    if compute_dtype is None:
        compute_dtype = pillar_features.dtype
    total_rows = nz * nx * ny
    num_tiles = int(pl.cdiv(total_rows, tm))

    # Destination column per pillar (exact reference formula; batch_size == 1).
    flat_idx = (coords[:, 1] + coords[:, 2] * nx + coords[:, 3]).astype(jnp.int32)

    # Sort points by destination column -> each output tile owns a contiguous run.
    order = jnp.argsort(flat_idx)
    sorted_idx = flat_idx[order]                                    # [N]
    sorted_feat = pillar_features[order].astype(compute_dtype)      # [N, C]

    # Pad the point axis to whole K windows.  Sentinel column id is larger than
    # any column id ever compared in-kernel; padded features are zero.
    n_pad = max(k_win, int(pl.cdiv(max(N, 1), k_win)) * k_win)
    sentinel = num_tiles * tm
    idx_p = jnp.full((n_pad, 1), sentinel, dtype=jnp.int32).at[:N, 0].set(sorted_idx)
    feat_p = jnp.zeros((n_pad, C), dtype=compute_dtype).at[:N, :].set(sorted_feat)

    # Per-tile run [starts, ends) in the sorted point array and the K windows it
    # spans.  The in-kernel loop covers the whole run, so runs spanning any
    # number of windows are handled (no dropped tails).
    tile_lo = jnp.arange(num_tiles, dtype=jnp.int32) * tm
    starts = jnp.searchsorted(sorted_idx, tile_lo, side="left").astype(jnp.int32)
    ends = jnp.searchsorted(sorted_idx, tile_lo + tm, side="left").astype(jnp.int32)
    counts = ends - starts
    win_lo = starts // k_win
    win_hi = jnp.maximum(ends - 1, starts) // k_win
    nwin = jnp.where(counts > 0, win_hi - win_lo + 1, 0).astype(jnp.int32)
    max_blk = n_pad // k_win - 1
    start_off = (jnp.minimum(win_lo, max_blk) * k_win).astype(jnp.int32)

    kernel = functools.partial(_scatter_kernel, k_win=k_win)
    out_flat = pl.pallas_call(
        kernel,
        # Exact-size output: no padded canvas + post-kernel slice; the ragged
        # last block (if any) is masked by Pallas on writeback.
        out_shape=jax.ShapeDtypeStruct((C, total_rows), pillar_features.dtype),
        grid_spec=pltpu.PrefetchScalarGridSpec(
            num_scalar_prefetch=2,
            grid=(num_tiles,),
            in_specs=[
                # Full-array blocks with constant block index: DMA'd into VMEM
                # once, reused by every grid step (no overlapping-window
                # re-fetch).  TODO(synk): for very large N, pack idx lane-dense
                # to avoid the [n_pad, 1] lane-padding in VMEM.
                pl.BlockSpec((n_pad, 1), lambda i, s, n: (0, 0)),   # idx_p
                pl.BlockSpec((n_pad, C), lambda i, s, n: (0, 0)),   # feat_p
            ],
            out_specs=pl.BlockSpec((C, tm), lambda i, s, n: (0, i)),
        ),
        compiler_params=pltpu.CompilerParams(
            dimension_semantics=("parallel",),       # megacore-shardable (v7x)
            vmem_limit_bytes=32 * 1024 * 1024,
        ),
    )(start_off, nwin, idx_p, feat_p)

    # [C, nz*nx*ny] -> [1, C*nz, ny, nx]  (no transpose pass over the canvas).
    return out_flat.reshape(1, C * nz, ny, nx)


if __name__ == "__main__":
    key = jax.random.PRNGKey(0)

    # Small shapes consistent with the module (NUM_BEV_FEATURES=32, nz=1).
    C = 32
    nx, ny, nz = 32, 24, 1          # BEV canvas 24 x 32 -> 768 columns
    N = 200                         # number of non-empty pillars

    k_feat, k_idx = jax.random.split(key)
    pillar_features = jax.random.normal(k_feat, (N, C), dtype=jnp.float32)

    # Unique pillar locations (PointPillars guarantees one pillar per (y, x)).
    flat_pos = jax.random.permutation(k_idx, nx * ny)[:N]
    ys = (flat_pos // nx).astype(jnp.int32)
    xs = (flat_pos % nx).astype(jnp.int32)
    zeros = jnp.zeros((N,), dtype=jnp.int32)
    coords = jnp.stack([zeros, zeros, ys, xs], axis=1)   # (batch_idx, z, y, x)

    # Reference: exact PyTorch-module semantics in plain JAX.
    def reference(feats):
        ref_idx = coords[:, 1] + coords[:, 2] * nx + coords[:, 3]
        spatial = jnp.zeros((C, nz * nx * ny), dtype=jnp.float32)
        spatial = spatial.at[:, ref_idx].set(feats.T)
        return spatial.reshape(1, C * nz, ny, nx)

    ref = reference(pillar_features)

    # f32 path (bit-exact): sweep tile / window sizes, covering the ragged last
    # output block (768 % 512 != 0) and multi-window runs (k_win < run length).
    for tile, kw in ((512, 256), (512, 128), (256, 128)):
        out = point_pillar_scatter(pillar_features, coords, nx, ny, nz,
                                   tm=tile, k_win=kw)
        out = jax.block_until_ready(out)
        assert out.shape == (1, C * nz, ny, nx)
        assert jnp.allclose(out, ref, atol=1e-6), f"mismatch (tm={tile}, k_win={kw})"

    # bf16 compute path (MXU-native): exact up to bf16 rounding of the features.
    ref_bf16 = reference(pillar_features.astype(jnp.bfloat16).astype(jnp.float32))
    out_bf16 = point_pillar_scatter(pillar_features, coords, nx, ny, nz,
                                    tm=512, k_win=256, compute_dtype=jnp.bfloat16)
    out_bf16 = jax.block_until_ready(out_bf16)
    assert out_bf16.shape == (1, C * nz, ny, nx)
    assert jnp.allclose(out_bf16, ref_bf16, atol=1e-6), "mismatch (bf16 compute)"

    print("KERNEL_OK")
</pallas_src>

<mosaic_0001>
module attributes {stable_mosaic.version = 11 : i64} {
  func.func @_scatter_kernel(%arg0: i32, %arg1: memref<2xi32, #tpu.memory_space<smem>>, %arg2: memref<2xi32, #tpu.memory_space<smem>>, %arg3: memref<256x1xi32, #tpu.memory_space<vmem>>, %arg4: memref<256x32xf32, #tpu.memory_space<vmem>>, %arg5: memref<32x512xf32, #tpu.memory_space<vmem>>) attributes {dimension_semantics = [#tpu.dimension_semantics<parallel>], iteration_bounds = array<i64: 2>, scalar_prefetch = 2 : i64, scratch_operands = 0 : i64, tpu.core_type = #tpu.core_type<tc>, window_params = [{pipeline_mode = #tpu.pipeline_mode<synchronous>, transform_indices = @transform_0, window_bounds = array<i64: 256, 1>}, {pipeline_mode = #tpu.pipeline_mode<synchronous>, transform_indices = @transform_1, window_bounds = array<i64: 256, 32>}, {transform_indices = @transform_2, window_bounds = array<i64: 32, 512>}]} {
    %cst = arith.constant 0.000000e+00 : f32
    %0 = vector.broadcast %cst : f32 to vector<32x512xf32>
    %c0 = arith.constant 0 : index
    %c0_0 = arith.constant 0 : index
    %1 = vector.load %arg5[%c0, %c0_0] : memref<32x512xf32, #tpu.memory_space<vmem>>, vector<32x512xf32>
    tpu.vector_store %arg5[%c0, %c0_0], %0 {strides = array<i32>} : memref<32x512xf32, #tpu.memory_space<vmem>>, vector<32x512xf32>,
    %2 = arith.index_cast %arg0 : i32 to index
    %3 = memref.load %arg2[%2] : memref<2xi32, #tpu.memory_space<smem>>
    %c0_i32 = arith.constant 0 : i32
    %4 = arith.cmpi sgt, %3, %c0_i32 : i32
    %5 = arith.extui %4 : i1 to i32
    %c0_i32_1 = arith.constant 0 : i32
    %6 = arith.cmpi ne, %5, %c0_i32_1 : i32
    scf.if %6 {
      %c512_i32 = arith.constant 512 : i32
      %7 = arith.muli %arg0, %c512_i32 : i32
      %8 = tpu.iota {dimensions = array<i32: 1>} : vector<1x512xi32>
      %9 = vector.broadcast %7 : i32 to vector<1x512xi32>
      %10 = arith.addi %9, %8 : vector<1x512xi32>
      %11 = arith.index_cast %arg0 : i32 to index
      %12 = memref.load %arg1[%11] : memref<2xi32, #tpu.memory_space<smem>>
      %c0_i32_2 = arith.constant 0 : i32
      %13 = arith.subi %3, %c0_i32_2 : i32
      %c1_i32 = arith.constant 1 : i32
      %c1_i32_3 = arith.constant 1 : i32
      %14 = arith.subi %c1_i32, %c1_i32_3 : i32
      %15 = arith.addi %13, %14 : i32
      %c1_i32_4 = arith.constant 1 : i32
      %16 = arith.divsi %15, %c1_i32_4 : i32
      %c1_i32_5 = arith.constant 1 : i32
      %c0_i32_6 = arith.constant 0 : i32
      %c0_i32_7 = arith.constant 0 : i32
      %17 = arith.subi %16, %c0_i32_7 : i32
      %18 = arith.addi %c0_i32_7, %17 : i32
      %c1_i32_8 = arith.constant 1 : i32
      scf.for %arg6 = %c0_i32_7 to %18 step %c1_i32_8  : i32 {
        %19 = arith.muli %arg6, %c1_i32_5 : i32
        %20 = arith.addi %c0_i32_6, %19 : i32
        %c256_i32 = arith.constant 256 : i32
        %21 = arith.muli %20, %c256_i32 : i32
        %22 = arith.addi %12, %21 : i32
        %23 = tpu.assume_multiple %22, 256 : i32
        %24 = arith.index_cast %23 : i32 to index
        %c0_9 = arith.constant 0 : index
        %25 = vector.load %arg3[%24, %c0_9] : memref<256x1xi32, #tpu.memory_space<vmem>>, vector<256x1xi32>
        %26 = arith.index_cast %23 : i32 to index
        %c0_10 = arith.constant 0 : index
        %27 = vector.load %arg4[%26, %c0_10] : memref<256x32xf32, #tpu.memory_space<vmem>>, vector<256x32xf32>
        %28 = vector.broadcast %25 : vector<256x1xi32> to vector<256x512xi32>
        %29 = vector.broadcast %10 : vector<1x512xi32> to vector<256x512xi32>
        %30 = arith.cmpi eq, %28, %29 : vector<256x512xi32>
        %31 = arith.extui %30 : vector<256x512xi1> to vector<256x512xi32>
        %32 = arith.sitofp %31 : vector<256x512xi32> to vector<256x512xf32>
        %c0_11 = arith.constant 0 : index
        %c0_12 = arith.constant 0 : index
        %33 = vector.load %arg5[%c0_11, %c0_12] : memref<32x512xf32, #tpu.memory_space<vmem>>, vector<32x512xf32>
        %cst_13 = arith.constant dense<0.000000e+00> : vector<32x512xf32>
        %34 = tpu.matmul %27, %32, %cst_13 {dimension_numbers = #tpu.dot_dimension_numbers<[0], [0], [1], [1], [0, 1, 1, 1], [], []>} : vector<256x32xf32>, vector<256x512xf32>, vector<32x512xf32> -> vector<32x512xf32>
        %35 = arith.addf %33, %34 : vector<32x512xf32>
        %c0_14 = arith.constant 0 : index
        %c0_15 = arith.constant 0 : index
        %36 = vector.load %arg5[%c0_14, %c0_15] : memref<32x512xf32, #tpu.memory_space<vmem>>, vector<32x512xf32>
        tpu.vector_store %arg5[%c0_14, %c0_15], %35 {strides = array<i32>} : memref<32x512xf32, #tpu.memory_space<vmem>>, vector<32x512xf32>,
      }
    } else {
    }
    return
  }
  func.func @transform_0(%arg0: i32, %arg1: memref<2xi32, #tpu.memory_space<smem>>, %arg2: memref<2xi32, #tpu.memory_space<smem>>) -> (i32, i32) {
    %c0_i32 = arith.constant 0 : i32
    %c0_i32_0 = arith.constant 0 : i32
    %c0_i32_1 = arith.constant 0 : i32
    return %c0_i32, %c0_i32_0 : i32, i32
  }
  func.func @transform_1(%arg0: i32, %arg1: memref<2xi32, #tpu.memory_space<smem>>, %arg2: memref<2xi32, #tpu.memory_space<smem>>) -> (i32, i32) {
    %c0_i32 = arith.constant 0 : i32
    %c0_i32_0 = arith.constant 0 : i32
    %c0_i32_1 = arith.constant 0 : i32
    return %c0_i32, %c0_i32_0 : i32, i32
  }
  func.func @transform_2(%arg0: i32, %arg1: memref<2xi32, #tpu.memory_space<smem>>, %arg2: memref<2xi32, #tpu.memory_space<smem>>) -> (i32, i32) {
    %c0_i32 = arith.constant 0 : i32
    %c0_i32_0 = arith.constant 0 : i32
    return %c0_i32, %arg0 : i32, i32
  }
}

</mosaic_0001>

<bundles_post_ra>
// kernel: tpu_custom_call.1
= control target key start
LH: loop header
LB: loop body
LE: loop exit
PB: predicated region body
PF: predicated region fallthrough
CT: control target
= control target key end

     0   :  { %s2153_s0 = inlined_call_operand.vmem [shape: s32[2], index: 0, kind: input, shape index: {}]   ;;  %s2154_s2 = inlined_call_operand.vmem [shape: s32[256,1], index: 2, kind: input, shape index: {}]   ;;  %s2155_s3 = inlined_call_operand.vmem [shape: f32[256,32], index: 3, kind: input, shape index: {}]   ;;  %s2156_s4 = inlined_call_operand.hbm [shape: f32[32,768], index: 4, kind: output, shape index: {}]   ;;  %s2157_s1 = inlined_call_operand.vmem [shape: s32[2], index: 1, kind: input, shape index: {}]  }
   0x1   :  { %s9_s17 = sshll.u32 %s2153_s0, 4  ;;  %s13_s20 = sshll.u32 %s2157_s1, 4  ;;  %s10_s17 = int_to_ptr.vmem [resolvable:$true] %s9_s17  ;;  %s14_s20 = int_to_ptr.vmem [resolvable:$true] %s13_s20 }
   0x2   :  { %s1482_s21 = scalar_lea.vmem %s10_s17, 16  ;;  %p1487_p1 = scmp.lt.s32.totalorder %s10_s17, %s10_s17 }
   0x3   :  { %p1483_p0 = scmp.ne.s32.totalorder %s10_s17, %s1482_s21  ;;  %p1488_p2 = scmp.lt.s32.totalorder %s1482_s21, %s1482_s21 }
   0x5   :  { %p1489_p3 = por %p1488_p2, %p1487_p1 }
   0x7   :  { %p1490_p4 = pnand %p1489_p3, %p1483_p0 }
   0x9   :  { %1493 = shalt.err (!%p1490_p4)  }
   0xa   :  { %s1578_s22 = smov [#allocation3]   ;;  %s1494_s23 = scalar_lea.vmem %s14_s20, 16 }
   0xb   :  { %12 = dma.vmem_to_smem %s10_s17, 16, %s1578_s22, [#allocation2] }
   0xc   :  { %p1495_p5 = scmp.ne.s32.totalorder %s14_s20, %s1494_s23  ;;  %p1499_p6 = scmp.lt.s32.totalorder %s14_s20, %s14_s20 }
   0xd   :  { %p1500_p7 = scmp.lt.s32.totalorder %s1494_s23, %s1494_s23 }
   0xf   :  { %p1501_p8 = por %p1500_p7, %p1499_p6 }
  0x11   :  { %p1502_p9 = pnand %p1501_p8, %p1495_p5 }
  0x13   :  { %1505 = shalt.err (!%p1502_p9)  }
  0x14   :  { %s1579_s0 = smov [#allocation4]  }
  0x15   :  { %16 = dma.vmem_to_smem %s14_s20, 16, %s1579_s0, [#allocation2] }
  0x16   :  { %1552 = dma.done.wait [#allocation2], 32 }
  0x17   :  { %1553 = vsyncadd [#allocation2], 4294967264 }
  0x18   :  { %18 = sfence }
  0x19   :  { %19 = vsyncpa [#allocation6], 0 }
  0x1a   :  { %21 = vsyncpa [#allocation6 + $0x1], 0  ;;  %s1617_s1 = smov 0   ;;  %s1619_s24 = smov 0  }
  0x1b   :  { %s1621_s25 = smov 0   ;;  %s1623_s26 = smov 0  }
  0x1c LB: > { %s1638_s27 = sadd.s32 4294967295, %s1572_s26   ;;  %s1098_s28 = sadd.s32 4294967294, %s1572_s26   ;;  %s1572_s26 = sphi %s1623_s26, %s2163_s26   ;;  %s1568_s25 = sphi %s1621_s25, %s2162_s25   ;;  %s1564_s24 = sphi %s1619_s24, %s2161_s24   ;;  %s1560_s1 = sphi %s1617_s1, %s2160_s1  }
  0x1d   : > { %s1642_s29 = sadd.s32 1, %s1572_s26   ;;  %s76_s30 = sadd.s32 1, %s1568_s25 }
  0x1e   : > { %s73_s5 = ssub.s32 %s1572_s26, %s1642_s29  ;;  %p86_p10 = scmp.ne.s32.totalorder %s1568_s25, %s1564_s24 }
  0x1f   : > { %p74_p11 = scmp.eq.s32.totalorder %s73_s5, 0  ;;  %p87_p12 = scmp.eq.s32.totalorder %s1638_s27, 1 }
  0x20   : > { %p92_p13 = scmp.ne.s32.totalorder %s1564_s24, %s1560_s1  ;;  %p93_p0 = scmp.eq.s32.totalorder %s1098_s28, 1 }
  0x21   : > { %s1653_s6 = scalar_select %p74_p11, %s1568_s25, %s76_s30  }
  0x22   : > { %p1655_p1 = por %p87_p12, %p86_p10  ;;  %p1659_p2 = por %p93_p0, %p92_p13 }
  0x23   : > { %p1100_p3 = scmp.ge.s32.totalorder %s1572_s26, 1  ;;  %p117_p4 = scmp.lt.s32.totalorder %s1572_s26, 3 }
  0x25   : > { %p118_p5 = pnand %p1100_p3, %p117_p4 }
  0x26   : > { %s131_s9 = sand.u32 (!%p118_p5), 1, %s1564_s24   ;;  %s1667_s10 = sld [smem:[#allocation4 + %s1638_s27]] (!%p118_p5) }
  0x27   : > { %121 = sbr.rel (%p118_p5) target bundleno = 528 (0x210), region = 28  ;;  %s1101_s11 = sshll.u32 (!%p118_p5), %s131_s9, 7 }
  0x28   : > { %s1671_s12 = scalar_lea.vmem (!%p118_p5), [#allocation5], %s1101_s11 }
  0x2c   : > { %v1580_v0 = vmov 0.0   ;;  %p1102_p6 = scmp.le.s32.totalorder %s1667_s10, 0 }
  0x2d   : > { %139 = vst [vmem:[%s1671_s12] sm:$0xff] %v1580_v0  ;;  %140 = vst [vmem:[%s1671_s12 + $0x8] sm:$0xff] %v1580_v0  ;;  %s1103_s13 = sshll.u32 (!%p1102_p6), %s1638_s27, 9  ;;  %s1694_s14 = sld [smem:[#allocation3 + %s1638_s27]] (!%p1102_p6) }
  0x2e   : > { %141 = vst [vmem:[%s1671_s12 + $0x10] sm:$0xff] %v1580_v0  ;;  %142 = vst [vmem:[%s1671_s12 + $0x18] sm:$0xff] %v1580_v0 }
  0x2f   : > { %143 = vst [vmem:[%s1671_s12 + $0x20] sm:$0xff] %v1580_v0  ;;  %144 = vst [vmem:[%s1671_s12 + $0x28] sm:$0xff] %v1580_v0 }
  0x30   : > { %145 = vst [vmem:[%s1671_s12 + $0x30] sm:$0xff] %v1580_v0  ;;  %146 = vst [vmem:[%s1671_s12 + $0x38] sm:$0xff] %v1580_v0  ;;  %159 = sbr.rel (%p1102_p6) target bundleno = 495 (0x1ef), region = 32 }
  0x31   : > { %147 = vst [vmem:[%s1671_s12 + $0x40] sm:$0xff] %v1580_v0  ;;  %148 = vst [vmem:[%s1671_s12 + $0x48] sm:$0xff] %v1580_v0 }
  0x32   : > { %149 = vst [vmem:[%s1671_s12 + $0x50] sm:$0xff] %v1580_v0  ;;  %150 = vst [vmem:[%s1671_s12 + $0x58] sm:$0xff] %v1580_v0 }
  0x33   : > { %151 = vst [vmem:[%s1671_s12 + $0x60] sm:$0xff] %v1580_v0  ;;  %152 = vst [vmem:[%s1671_s12 + $0x68] sm:$0xff] %v1580_v0 }
  0x34   : > { %153 = vst [vmem:[%s1671_s12 + $0x70] sm:$0xff] %v1580_v0  ;;  %154 = vst [vmem:[%s1671_s12 + $0x78] sm:$0xff] %v1580_v0 }
  0x35   : > { %v161_v1 = vlaneseq  ;;  %v166_v2 = vstv %s1103_s13  ;;  %s1706_s15 = smov (!%p1102_p6), 0  }
  0x37   : > { %v162_v3 = vand.u32 127, %v161_v1  ;;  %1080 = sbr.rel (%p1102_p6) target bundleno = 495 (0x1ef), region = 67 }
  0x39   : > { %v163_v4 = vadd.s32 128, %v162_v3  ;;  %v164_v5 = vadd.s32 256, %v162_v3  ;;  %v165_v6 = vadd.s32 384, %v162_v3  ;;  %v1696_v7 = vadd.s32 %v166_v2, %v162_v3 }
  0x3b   : > { %v1698_v8 = vadd.s32 %v166_v2, %v163_v4  ;;  %v1700_v9 = vadd.s32 %v166_v2, %v164_v5  ;;  %v1702_v10 = vadd.s32 %v166_v2, %v165_v6 }
  0x3c LB: >> { %v1581_v11 = vmov 0   ;;  %s1105_s16 = sshll.u32 %s1576_s15, 8  ;;  %s175_s15 = sadd.s32 1, %s1576_s15   ;;  %s1576_s15 = sphi %s1706_s15, %s175_s15  }
  0x3d   : >> { %1429 = vset.pattern.permute.xlu1 %v1581_v11  ;;  %1428 = vset.pattern.permute.xlu0 %v1581_v11  ;;  %s1713_s17 = sadd.s32 %s1105_s16, %s1694_s14  ;;  %p174_p7 = scmp.ge.s32.totalorder %s175_s15, %s1667_s10 }
  0x3e   : >> { %s1719_s20 = scalar_lea.vmem %s2154_s2, %s1713_s17  ;;  %s1757_s23 = scalar_lea.vmem %s2155_s3, %s1713_s17 }
  0x3f   : >> { %v196_v12 = vld [vmem:[%s1719_s20 + $0x78] sm:$0xff]  ;;  %v194_v13 = vld [vmem:[%s1719_s20 + $0x68] sm:$0xff]  ;;  %v195_v14 = vld [vmem:[%s1719_s20 + $0x70] sm:$0xff] }
  0x40   : >> { %292 = vperm.xlu0 %1428, %v196_v12   ;;  %286 = vperm.xlu1 %1429, %v194_v13   ;;  %v193_v15 = vld [vmem:[%s1719_s20 + $0x60] sm:$0xff]  ;;  %v192_v16 = vld [vmem:[%s1719_s20 + $0x58] sm:$0xff]  ;;  %v191_v17 = vld [vmem:[%s1719_s20 + $0x50] sm:$0xff] }
  0x41   : >> { %v190_v18 = vld [vmem:[%s1719_s20 + $0x48] sm:$0xff]  ;;  %v189_v19 = vld [vmem:[%s1719_s20 + $0x40] sm:$0xff]  ;;  %v188_v20 = vld [vmem:[%s1719_s20 + $0x38] sm:$0xff] }
  0x42   : >> { %v187_v21 = vld [vmem:[%s1719_s20 + $0x30] sm:$0xff]  ;;  %v186_v22 = vld [vmem:[%s1719_s20 + $0x28] sm:$0xff]  ;;  %v185_v23 = vld [vmem:[%s1719_s20 + $0x20] sm:$0xff] }
  0x43   : >> { %v184_v24 = vld [vmem:[%s1719_s20 + $0x18] sm:$0xff]  ;;  %v183_v25 = vld [vmem:[%s1719_s20 + $0x10] sm:$0xff]  ;;  %v182_v26 = vld [vmem:[%s1719_s20 + $0x8] sm:$0xff] }
  0x44   : >> { %289 = vperm.xlu0 %1428, %v195_v14   ;;  %283 = vperm.xlu1 %1429, %v193_v15   ;;  %v181_v27 = vld [vmem:[%s1719_s20] sm:$0xff]  ;;  %v212_v28 = vld [vmem:[%s1719_s20 + $0xf8] sm:$0xff]  ;;  %v211_v29 = vld [vmem:[%s1719_s20 + $0xf0] sm:$0xff] }
  0x45   : >> { %v210_v30 = vld [vmem:[%s1719_s20 + $0xe8] sm:$0xff]  ;;  %v209_v31 = vld [vmem:[%s1719_s20 + $0xe0] sm:$0xff]  ;;  %v208_v32 = vld [vmem:[%s1719_s20 + $0xd8] sm:$0xff] }
  0x46   : >> { %v207_v33 = vld [vmem:[%s1719_s20 + $0xd0] sm:$0xff]  ;;  %v206_v34 = vld [vmem:[%s1719_s20 + $0xc8] sm:$0xff]  ;;  %v205_v35 = vld [vmem:[%s1719_s20 + $0xc0] sm:$0xff] }
  0x47   : >> { %v204_v36 = vld [vmem:[%s1719_s20 + $0xb8] sm:$0xff]  ;;  %v203_v37 = vld [vmem:[%s1719_s20 + $0xb0] sm:$0xff]  ;;  %v202_v38 = vld [vmem:[%s1719_s20 + $0xa8] sm:$0xff] }
  0x48   : >> { %280 = vperm.xlu0 %1428, %v192_v16   ;;  %277 = vperm.xlu1 %1429, %v191_v17   ;;  %v201_v39 = vld [vmem:[%s1719_s20 + $0xa0] sm:$0xff]  ;;  %v200_v40 = vld [vmem:[%s1719_s20 + $0x98] sm:$0xff]  ;;  %v199_v41 = vld [vmem:[%s1719_s20 + $0x90] sm:$0xff] }
  0x49   : >> { %v198_v42 = vld [vmem:[%s1719_s20 + $0x88] sm:$0xff]  ;;  %v197_v43 = vld [vmem:[%s1719_s20 + $0x80] sm:$0xff]  ;;  %v216_v50 = vld [vmem:[%s1757_s23 + $0x10] sm:$0xff] }
  0x4a   : >> { %v214_v44 = vld [vmem:[%s1757_s23] sm:$0xff]  ;;  %v215_v47 = vld [vmem:[%s1757_s23 + $0x8] sm:$0xff]  ;;  %v232_v51 = vld [vmem:[%s1757_s23 + $0x90] sm:$0xff] }
  0x4b   : >> { %v230_v45 = vld [vmem:[%s1757_s23 + $0x80] sm:$0xff]  ;;  %v231_v48 = vld [vmem:[%s1757_s23 + $0x88] sm:$0xff]  ;;  %v1434_v52 = vpack.i.bf16 %v216_v50, %v232_v51  ;;  %v217_v53 = vld [vmem:[%s1757_s23 + $0x18] sm:$0xff] }
  0x4c   : >> { %274 = vperm.xlu0 %1428, %v190_v18   ;;  %271 = vperm.xlu1 %1429, %v189_v19   ;;  %v1430_v46 = vpack.i.bf16 %v214_v44, %v230_v45  ;;  %v1432_v49 = vpack.i.bf16 %v215_v47, %v231_v48  ;;  %v233_v54 = vld [vmem:[%s1757_s23 + $0x98] sm:$0xff]  ;;  %v218_v56 = vld [vmem:[%s1757_s23 + $0x20] sm:$0xff]  ;;  %v219_v59 = vld [vmem:[%s1757_s23 + $0x28] sm:$0xff]  ;;  %v1582_v18 = vmov 1.0  }
  0x4d   : >> { %v1436_v55 = vpack.i.bf16 %v217_v53, %v233_v54  ;;  %v234_v57 = vld [vmem:[%s1757_s23 + $0xa0] sm:$0xff]  ;;  %v235_v60 = vld [vmem:[%s1757_s23 + $0xa8] sm:$0xff]  ;;  %v220_v62 = vld [vmem:[%s1757_s23 + $0x30] sm:$0xff] }
  0x4e   : >> { %v1438_v58 = vpack.i.bf16 %v218_v56, %v234_v57  ;;  %v1440_v61 = vpack.i.bf16 %v219_v59, %v235_v60  ;;  %v236_v63 = vld [vmem:[%s1757_s23 + $0xb0] sm:$0xff]  ;;  %v221_v1 = vld [vmem:[%s1757_s23 + $0x38] sm:$0xff]  ;;  %v222_v4 = vld [vmem:[%s1757_s23 + $0x40] sm:$0xff] }
  0x4f   : >> { %v1442_v0 = vpack.i.bf16 %v220_v62, %v236_v63  ;;  %v237_v2 = vld [vmem:[%s1757_s23 + $0xb8] sm:$0xff]  ;;  %v238_v5 = vld [vmem:[%s1757_s23 + $0xc0] sm:$0xff]  ;;  %v223_v11 = vld [vmem:[%s1757_s23 + $0x48] sm:$0xff] }
  0x50   : >> { %268 = vperm.xlu0 %1428, %v188_v20   ;;  %265 = vperm.xlu1 %1429, %v187_v21   ;;  %v1444_v3 = vpack.i.bf16 %v221_v1, %v237_v2  ;;  %v1446_v6 = vpack.i.bf16 %v222_v4, %v238_v5  ;;  %v239_v12 = vld [vmem:[%s1757_s23 + $0xc8] sm:$0xff]  ;;  %v224_v16 = vld [vmem:[%s1757_s23 + $0x50] sm:$0xff] }
  0x51   : >> { %v1448_v15 = vpack.i.bf16 %v223_v11, %v239_v12  ;;  %v240_v17 = vld [vmem:[%s1757_s23 + $0xd0] sm:$0xff] }
  0x52   : >> { %v1450_v21 = vpack.i.bf16 %v224_v16, %v240_v17  ;;  %v726_v17 = vld [vmem:[%s1671_s12] sm:$0xff] }
  0x54   : >> { %262 = vperm.xlu0 %1428, %v186_v22   ;;  %259 = vperm.xlu1 %1429, %v185_v23   ;;  %v225_v22 = vld [vmem:[%s1757_s23 + $0x58] sm:$0xff] }
  0x55   : >> { %v241_v23 = vld [vmem:[%s1757_s23 + $0xd8] sm:$0xff] }
  0x58   : >> { %256 = vperm.xlu0 %1428, %v184_v24   ;;  %253 = vperm.xlu1 %1429, %v183_v25  }
  0x5c   : >> { %250 = vperm.xlu0 %1428, %v182_v26   ;;  %247 = vperm.xlu1 %1429, %v181_v27   ;;  %v1452_v26 = vpack.i.bf16 %v225_v22, %v241_v23  ;;  %v226_v27 = vld [vmem:[%s1757_s23 + $0x60] sm:$0xff]  ;;  %v729_v22 = vld [vmem:[%s1671_s12 + $0x18] sm:$0xff] }
  0x60   : >> { %340 = vperm.xlu0 %1428, %v212_v28   ;;  %337 = vperm.xlu1 %1429, %v211_v29   ;;  %v242_v28 = vld [vmem:[%s1757_s23 + $0xe0] sm:$0xff] }
  0x61   : >> { %v1454_v29 = vpack.i.bf16 %v226_v27, %v242_v28  ;;  %v730_v27 = vld [vmem:[%s1671_s12 + $0x20] sm:$0xff]  ;;  %v732_v28 = vld [vmem:[%s1671_s12 + $0x30] sm:$0xff] }
  0x64   : >> { %334 = vperm.xlu0 %1428, %v210_v30   ;;  %331 = vperm.xlu1 %1429, %v209_v31  }
  0x68   : >> { %328 = vperm.xlu0 %1428, %v208_v32   ;;  %325 = vperm.xlu1 %1429, %v207_v33   ;;  %v227_v32 = vld [vmem:[%s1757_s23 + $0x68] sm:$0xff] }
  0x69   : >> { %v243_v33 = vld [vmem:[%s1757_s23 + $0xe8] sm:$0xff] }
  0x6c   : >> { %322 = vperm.xlu0 %1428, %v206_v34   ;;  %319 = vperm.xlu1 %1429, %v205_v35   ;;  %v1456_v34 = vpack.i.bf16 %v227_v32, %v243_v33  ;;  %v731_v33 = vld [vmem:[%s1671_s12 + $0x28] sm:$0xff] }
  0x70   : >> { %316 = vperm.xlu0 %1428, %v204_v36   ;;  %313 = vperm.xlu1 %1429, %v203_v37   ;;  %v228_v37 = vld [vmem:[%s1757_s23 + $0x70] sm:$0xff] }
  0x74   : >> { %310 = vperm.xlu0 %1428, %v202_v38   ;;  %307 = vperm.xlu1 %1429, %v201_v39   ;;  %v244_v38 = vld [vmem:[%s1757_s23 + $0xf0] sm:$0xff] }
  0x78   : >> { %304 = vperm.xlu0 %1428, %v200_v40   ;;  %301 = vperm.xlu1 %1429, %v199_v41   ;;  %v1458_v41 = vpack.i.bf16 %v228_v37, %v244_v38 }
  0x7c   : >> { %298 = vperm.xlu0 %1428, %v198_v42   ;;  %295 = vperm.xlu1 %1429, %v197_v43   ;;  %v229_v42 = vld [vmem:[%s1757_s23 + $0x78] sm:$0xff] }
  0x7d   : >> { %v245_v43 = vld [vmem:[%s1757_s23 + $0xf8] sm:$0xff] }
  0x9a   : >> { %1431 = vxpose.xlu0.b32.start [1/16] (narrow) %v1430_v46, 32  ;;  %v1460_v46 = vpack.i.bf16 %v229_v42, %v245_v43 }
  0x9e   : >> { %1433 = vxpose.xlu0.b32.cont [2/16] (narrow) %v1432_v49, 32 }
  0xa2   : >> { %1435 = vxpose.xlu0.b32.cont [3/16] (narrow) %v1434_v52, 32 }
  0xa6   : >> { %1437 = vxpose.xlu0.b32.cont [4/16] (narrow) %v1436_v55, 32 }
  0xaa   : >> { %1439 = vxpose.xlu0.b32.cont [5/16] (narrow) %v1438_v58, 32 }
  0xae   : >> { %1441 = vxpose.xlu0.b32.cont [6/16] (narrow) %v1440_v61, 32 }
  0xb2   : >> { %1443 = vxpose.xlu0.b32.cont [7/16] (narrow) %v1442_v0, 32 }
  0xb6   : >> { %1445 = vxpose.xlu0.b32.cont [8/16] (narrow) %v1444_v3, 32 }
  0xba   : >> { %1447 = vxpose.xlu0.b32.cont [9/16] (narrow) %v1446_v6, 32 }
  0xbb   : >> { %v293_v13 = vpop.permute.xlu0 %292  ;;  %v287_v14 = vpop.permute.xlu1 %286 }
  0xbc   : >> { %vm403_vm0 = vcmp.eq.s32.totalorder %v293_v13, %v1698_v8  ;;  %vm405_vm1 = vcmp.eq.s32.totalorder %v293_v13, %v1702_v10  ;;  %vm402_vm2 = vcmp.eq.s32.totalorder %v293_v13, %v1696_v7  ;;  %vm404_vm3 = vcmp.eq.s32.totalorder %v293_v13, %v1700_v9 }
  0xbd   : >> { %1234 = vmatprep.subr.msk.mxu0 %vm403_vm0, %v1582_v18  ;;  %1298 = vmatprep.subr.msk.mxu1 %vm405_vm1, %v1582_v18  ;;  %vm395_vm4 = vcmp.eq.s32.totalorder %v287_v14, %v1698_v8  ;;  %vm397_vm9 = vcmp.eq.s32.totalorder %v287_v14, %v1702_v10  ;;  %vm394_vm10 = vcmp.eq.s32.totalorder %v287_v14, %v1696_v7 }
  0xbe   : >> { %1235 = vmatpush1.msk.msra.mxu0 %vm402_vm2, %v1582_v18  ;;  %1299 = vmatpush1.msk.msra.mxu1 %vm404_vm3, %v1582_v18  ;;  %vm396_vm11 = vcmp.eq.s32.totalorder %v287_v14, %v1700_v9 }
  0xbf   : >> { %1449 = vxpose.xlu0.b32.cont [10/16] (narrow) %v1448_v15, 32  ;;  %v290_v19 = vpop.permute.xlu0 %289  ;;  %v284_v20 = vpop.permute.xlu1 %283 }
  0xc0   : >> { %vm399_vm5 = vcmp.eq.s32.totalorder %v290_v19, %v1698_v8  ;;  %vm401_vm6 = vcmp.eq.s32.totalorder %v290_v19, %v1702_v10  ;;  %vm398_vm7 = vcmp.eq.s32.totalorder %v290_v19, %v1696_v7  ;;  %vm400_vm8 = vcmp.eq.s32.totalorder %v290_v19, %v1700_v9 }
  0xc1   : >> { %1236 = vmatprep.subr.msk.mxu0 %vm399_vm5, %v1582_v18  ;;  %1300 = vmatprep.subr.msk.mxu1 %vm401_vm6, %v1582_v18  ;;  %vm391_vm12 = vcmp.eq.s32.totalorder %v284_v20, %v1698_v8  ;;  %vm393_vm13 = vcmp.eq.s32.totalorder %v284_v20, %v1702_v10  ;;  %vm390_vm14 = vcmp.eq.s32.totalorder %v284_v20, %v1696_v7 }
  0xc2   : >> { %1237 = vmatpush1.msk.msra.mxu0 %vm398_vm7, %v1582_v18  ;;  %1301 = vmatpush1.msk.msra.mxu1 %vm400_vm8, %v1582_v18  ;;  %vm392_vm15 = vcmp.eq.s32.totalorder %v284_v20, %v1700_v9 }
  0xc3   : >> { %1451 = vxpose.xlu0.b32.cont [11/16] (narrow) %v1450_v21, 32  ;;  %1238 = vmatprep.subr.msk.mxu0 %vm395_vm4, %v1582_v18  ;;  %v281_v24 = vpop.permute.xlu0 %280  ;;  %v278_v25 = vpop.permute.xlu1 %277  ;;  %v727_v21 = vld [vmem:[%s1671_s12 + $0x8] sm:$0xff] }
  0xc4   : >> { %1302 = vmatprep.subr.msk.mxu1 %vm397_vm9, %v1582_v18  ;;  %1239 = vmatpush1.msk.msra.mxu0 %vm394_vm10, %v1582_v18  ;;  %vm387_vm0 = vcmp.eq.s32.totalorder %v281_v24, %v1698_v8  ;;  %vm389_vm1 = vcmp.eq.s32.totalorder %v281_v24, %v1702_v10  ;;  %vm386_vm2 = vcmp.eq.s32.totalorder %v281_v24, %v1696_v7 }
  0xc5   : >> { %1303 = vmatpush1.msk.msra.mxu1 %vm396_vm11, %v1582_v18  ;;  %1240 = vmatprep.subr.msk.mxu0 %vm391_vm12, %v1582_v18  ;;  %vm383_vm3 = vcmp.eq.s32.totalorder %v278_v25, %v1698_v8  ;;  %vm385_vm4 = vcmp.eq.s32.totalorder %v278_v25, %v1702_v10  ;;  %vm388_vm5 = vcmp.eq.s32.totalorder %v281_v24, %v1700_v9 }
  0xc6   : >> { %1304 = vmatprep.subr.msk.mxu1 %vm393_vm13, %v1582_v18  ;;  %1241 = vmatpush1.msk.msra.mxu0 %vm390_vm14, %v1582_v18  ;;  %vm382_vm6 = vcmp.eq.s32.totalorder %v278_v25, %v1696_v7  ;;  %vm384_vm7 = vcmp.eq.s32.totalorder %v278_v25, %v1700_v9 }
  0xc7   : >> { %1305 = vmatpush1.msk.msra.mxu1 %vm392_vm15, %v1582_v18  ;;  %1453 = vxpose.xlu0.b32.cont [12/16] (narrow) %v1452_v26, 32  ;;  %v275_v30 = vpop.permute.xlu0 %274  ;;  %v272_v31 = vpop.permute.xlu1 %271 }
  0xc8   : >> { %1242 = vmatprep.subr.msk.mxu0 %vm387_vm0, %v1582_v18  ;;  %1306 = vmatprep.subr.msk.mxu1 %vm389_vm1, %v1582_v18  ;;  %vm379_vm8 = vcmp.eq.s32.totalorder %v275_v30, %v1698_v8  ;;  %vm381_vm9 = vcmp.eq.s32.totalorder %v275_v30, %v1702_v10  ;;  %vm375_vm10 = vcmp.eq.s32.totalorder %v272_v31, %v1698_v8 }
  0xc9   : >> { %1243 = vmatpush1.msk.msra.mxu0 %vm386_vm2, %v1582_v18  ;;  %1307 = vmatpush1.msk.msra.mxu1 %vm388_vm5, %v1582_v18  ;;  %vm378_vm11 = vcmp.eq.s32.totalorder %v275_v30, %v1696_v7  ;;  %vm377_vm12 = vcmp.eq.s32.totalorder %v272_v31, %v1702_v10  ;;  %vm374_vm13 = vcmp.eq.s32.totalorder %v272_v31, %v1696_v7 }
  0xca   : >> { %1244 = vmatprep.subr.msk.mxu0 %vm383_vm3, %v1582_v18  ;;  %1308 = vmatprep.subr.msk.mxu1 %vm385_vm4, %v1582_v18  ;;  %vm380_vm14 = vcmp.eq.s32.totalorder %v275_v30, %v1700_v9  ;;  %vm376_vm15 = vcmp.eq.s32.totalorder %v272_v31, %v1700_v9 }
  0xcb   : >> { %1245 = vmatpush1.msk.msra.mxu0 %vm382_vm6, %v1582_v18  ;;  %1309 = vmatpush1.msk.msra.mxu1 %vm384_vm7, %v1582_v18  ;;  %v269_v35 = vpop.permute.xlu0 %268  ;;  %v266_v36 = vpop.permute.xlu1 %265 }
  0xcc   : >> { %1455 = vxpose.xlu0.b32.cont [13/16] (narrow) %v1454_v29, 32  ;;  %1246 = vmatprep.subr.msk.mxu0 %vm379_vm8, %v1582_v18  ;;  %vm371_vm0 = vcmp.eq.s32.totalorder %v269_v35, %v1698_v8  ;;  %vm373_vm1 = vcmp.eq.s32.totalorder %v269_v35, %v1702_v10  ;;  %vm370_vm2 = vcmp.eq.s32.totalorder %v269_v35, %v1696_v7 }
  0xcd   : >> { %1310 = vmatprep.subr.msk.mxu1 %vm381_vm9, %v1582_v18  ;;  %1247 = vmatpush1.msk.msra.mxu0 %vm378_vm11, %v1582_v18  ;;  %vm367_vm3 = vcmp.eq.s32.totalorder %v266_v36, %v1698_v8  ;;  %vm369_vm4 = vcmp.eq.s32.totalorder %v266_v36, %v1702_v10  ;;  %vm372_vm5 = vcmp.eq.s32.totalorder %v269_v35, %v1700_v9 }
  0xce   : >> { %1311 = vmatpush1.msk.msra.mxu1 %vm380_vm14, %v1582_v18  ;;  %1248 = vmatprep.subr.msk.mxu0 %vm375_vm10, %v1582_v18  ;;  %vm366_vm6 = vcmp.eq.s32.totalorder %v266_v36, %v1696_v7  ;;  %vm368_vm7 = vcmp.eq.s32.totalorder %v266_v36, %v1700_v9 }
  0xcf   : >> { %1312 = vmatprep.subr.msk.mxu1 %vm377_vm12, %v1582_v18  ;;  %1249 = vmatpush1.msk.msra.mxu0 %vm374_vm13, %v1582_v18  ;;  %v263_v39 = vpop.permute.xlu0 %262  ;;  %v260_v40 = vpop.permute.xlu1 %259 }
  0xd0   : >> { %1313 = vmatpush1.msk.msra.mxu1 %vm376_vm15, %v1582_v18  ;;  %1457 = vxpose.xlu0.b32.cont [14/16] (narrow) %v1456_v34, 32  ;;  %vm363_vm8 = vcmp.eq.s32.totalorder %v263_v39, %v1698_v8  ;;  %vm365_vm9 = vcmp.eq.s32.totalorder %v263_v39, %v1702_v10  ;;  %vm359_vm10 = vcmp.eq.s32.totalorder %v260_v40, %v1698_v8  ;;  %v733_v34 = vld [vmem:[%s1671_s12 + $0x38] sm:$0xff] }
  0xd1   : >> { %1250 = vmatprep.subr.msk.mxu0 %vm371_vm0, %v1582_v18  ;;  %1314 = vmatprep.subr.msk.mxu1 %vm373_vm1, %v1582_v18  ;;  %vm362_vm11 = vcmp.eq.s32.totalorder %v263_v39, %v1696_v7  ;;  %vm361_vm12 = vcmp.eq.s32.totalorder %v260_v40, %v1702_v10  ;;  %vm358_vm13 = vcmp.eq.s32.totalorder %v260_v40, %v1696_v7 }
  0xd2   : >> { %1251 = vmatpush1.msk.msra.mxu0 %vm370_vm2, %v1582_v18  ;;  %1315 = vmatpush1.msk.msra.mxu1 %vm372_vm5, %v1582_v18  ;;  %vm364_vm14 = vcmp.eq.s32.totalorder %v263_v39, %v1700_v9  ;;  %vm360_vm15 = vcmp.eq.s32.totalorder %v260_v40, %v1700_v9  ;;  %v734_v39 = vld [vmem:[%s1671_s12 + $0x40] sm:$0xff]  ;;  %v736_v40 = vld [vmem:[%s1671_s12 + $0x50] sm:$0xff] }
  0xd3   : >> { %1252 = vmatprep.subr.msk.mxu0 %vm367_vm3, %v1582_v18  ;;  %1316 = vmatprep.subr.msk.mxu1 %vm369_vm4, %v1582_v18  ;;  %v257_v44 = vpop.permute.xlu0 %256  ;;  %v254_v45 = vpop.permute.xlu1 %253 }
  0xd4   : >> { %1253 = vmatpush1.msk.msra.mxu0 %vm366_vm6, %v1582_v18  ;;  %1317 = vmatpush1.msk.msra.mxu1 %vm368_vm7, %v1582_v18  ;;  %vm355_vm0 = vcmp.eq.s32.totalorder %v257_v44, %v1698_v8  ;;  %vm357_vm1 = vcmp.eq.s32.totalorder %v257_v44, %v1702_v10  ;;  %vm354_vm2 = vcmp.eq.s32.totalorder %v257_v44, %v1696_v7 }
  0xd5   : >> { %1459 = vxpose.xlu0.b32.cont [15/16] (narrow) %v1458_v41, 32  ;;  %1254 = vmatprep.subr.msk.mxu0 %vm363_vm8, %v1582_v18  ;;  %vm351_vm3 = vcmp.eq.s32.totalorder %v254_v45, %v1698_v8  ;;  %vm353_vm4 = vcmp.eq.s32.totalorder %v254_v45, %v1702_v10  ;;  %vm356_vm5 = vcmp.eq.s32.totalorder %v257_v44, %v1700_v9 }
  0xd6   : >> { %1318 = vmatprep.subr.msk.mxu1 %vm365_vm9, %v1582_v18  ;;  %1255 = vmatpush1.msk.msra.mxu0 %vm362_vm11, %v1582_v18  ;;  %vm350_vm6 = vcmp.eq.s32.totalorder %v254_v45, %v1696_v7  ;;  %vm352_vm7 = vcmp.eq.s32.totalorder %v254_v45, %v1700_v9  ;;  %v735_v45 = vld [vmem:[%s1671_s12 + $0x48] sm:$0xff] }
  0xd7   : >> { %1319 = vmatpush1.msk.msra.mxu1 %vm364_vm14, %v1582_v18  ;;  %1256 = vmatprep.subr.msk.mxu0 %vm359_vm10, %v1582_v18  ;;  %v251_v47 = vpop.permute.xlu0 %250  ;;  %v248_v48 = vpop.permute.xlu1 %247 }
  0xd8   : >> { %1320 = vmatprep.subr.msk.mxu1 %vm361_vm12, %v1582_v18  ;;  %1257 = vmatpush1.msk.msra.mxu0 %vm358_vm13, %v1582_v18  ;;  %vm347_vm8 = vcmp.eq.s32.totalorder %v251_v47, %v1698_v8  ;;  %vm349_vm9 = vcmp.eq.s32.totalorder %v251_v47, %v1702_v10  ;;  %vm343_vm10 = vcmp.eq.s32.totalorder %v248_v48, %v1698_v8 }
  0xd9   : >> { %1321 = vmatpush1.msk.msra.mxu1 %vm360_vm15, %v1582_v18  ;;  %1461 = vxpose.xlu0.b32.end [16/16] (narrow) %v1460_v46, 32  ;;  %vm345_vm11 = vcmp.eq.s32.totalorder %v248_v48, %v1702_v10  ;;  %vm346_vm12 = vcmp.eq.s32.totalorder %v251_v47, %v1696_v7  ;;  %vm348_vm13 = vcmp.eq.s32.totalorder %v251_v47, %v1700_v9  ;;  %v737_v46 = vld [vmem:[%s1671_s12 + $0x58] sm:$0xff] }
  0xda   : >> { %1258 = vmatprep.subr.msk.mxu0 %vm355_vm0, %v1582_v18  ;;  %1322 = vmatprep.subr.msk.mxu1 %vm357_vm1, %v1582_v18  ;;  %vm342_vm14 = vcmp.eq.s32.totalorder %v248_v48, %v1696_v7  ;;  %vm344_vm15 = vcmp.eq.s32.totalorder %v248_v48, %v1700_v9 }
  0xdb   : >> { %1259 = vmatpush1.msk.msra.mxu0 %vm354_vm2, %v1582_v18  ;;  %1323 = vmatpush1.msk.msra.mxu1 %vm356_vm5, %v1582_v18  ;;  %v341_v49 = vpop.permute.xlu0 %340  ;;  %v338_v50 = vpop.permute.xlu1 %337 }
  0xdc   : >> { %1260 = vmatprep.subr.msk.mxu0 %vm351_vm3, %v1582_v18  ;;  %1324 = vmatprep.subr.msk.mxu1 %vm353_vm4, %v1582_v18  ;;  %vm467_vm0 = vcmp.eq.s32.totalorder %v341_v49, %v1698_v8  ;;  %vm469_vm1 = vcmp.eq.s32.totalorder %v341_v49, %v1702_v10  ;;  %vm466_vm2 = vcmp.eq.s32.totalorder %v341_v49, %v1696_v7 }
  0xdd   : >> { %1261 = vmatpush1.msk.msra.mxu0 %vm350_vm6, %v1582_v18  ;;  %1325 = vmatpush1.msk.msra.mxu1 %vm352_vm7, %v1582_v18  ;;  %vm468_vm3 = vcmp.eq.s32.totalorder %v341_v49, %v1700_v9  ;;  %vm463_vm4 = vcmp.eq.s32.totalorder %v338_v50, %v1698_v8  ;;  %vm465_vm5 = vcmp.eq.s32.totalorder %v338_v50, %v1702_v10 }
  0xde   : >> { %1262 = vmatprep.subr.msk.mxu0 %vm347_vm8, %v1582_v18  ;;  %1326 = vmatprep.subr.msk.mxu1 %vm349_vm9, %v1582_v18  ;;  %vm462_vm6 = vcmp.eq.s32.totalorder %v338_v50, %v1696_v7  ;;  %vm464_vm7 = vcmp.eq.s32.totalorder %v338_v50, %v1700_v9 }
  0xdf   : >> { %1263 = vmatpush1.msk.msra.mxu0 %vm346_vm12, %v1582_v18  ;;  %1327 = vmatpush1.msk.msra.mxu1 %vm348_vm13, %v1582_v18  ;;  %v335_v51 = vpop.permute.xlu0 %334  ;;  %v332_v52 = vpop.permute.xlu1 %331 }
  0xe0   : >> { %1264 = vmatprep.subr.msk.mxu0 %vm343_vm10, %v1582_v18  ;;  %1328 = vmatprep.subr.msk.mxu1 %vm345_vm11, %v1582_v18  ;;  %vm459_vm8 = vcmp.eq.s32.totalorder %v335_v51, %v1698_v8  ;;  %vm461_vm9 = vcmp.eq.s32.totalorder %v335_v51, %v1702_v10  ;;  %vm458_vm10 = vcmp.eq.s32.totalorder %v335_v51, %v1696_v7 }
  0xe1   : >> { %1265 = vmatpush1.msk.msra.mxu0 %vm342_vm14, %v1582_v18  ;;  %1329 = vmatpush1.msk.msra.mxu1 %vm344_vm15, %v1582_v18  ;;  %vm460_vm11 = vcmp.eq.s32.totalorder %v335_v51, %v1700_v9  ;;  %vm455_vm12 = vcmp.eq.s32.totalorder %v332_v52, %v1698_v8  ;;  %vm457_vm13 = vcmp.eq.s32.totalorder %v332_v52, %v1702_v10  ;;  %v738_v51 = vld [vmem:[%s1671_s12 + $0x60] sm:$0xff] }
  0xe2   : >> { %1266 = vmatprep.subr.msk.mxu0 %vm467_vm0, %v1582_v18  ;;  %1330 = vmatprep.subr.msk.mxu1 %vm469_vm1, %v1582_v18  ;;  %vm454_vm14 = vcmp.eq.s32.totalorder %v332_v52, %v1696_v7  ;;  %vm456_vm15 = vcmp.eq.s32.totalorder %v332_v52, %v1700_v9  ;;  %v740_v52 = vld [vmem:[%s1671_s12 + $0x70] sm:$0xff] }
  0xe3   : >> { %1267 = vmatpush2.msk.msra.mxu0 %vm466_vm2, %v1582_v18  ;;  %1331 = vmatpush2.msk.msra.mxu1 %vm468_vm3, %v1582_v18  ;;  %v329_v53 = vpop.permute.xlu0 %328  ;;  %v326_v54 = vpop.permute.xlu1 %325 }
  0xe4   : >> { %1268 = vmatprep.subr.msk.mxu0 %vm463_vm4, %v1582_v18  ;;  %1332 = vmatprep.subr.msk.mxu1 %vm465_vm5, %v1582_v18  ;;  %vm451_vm0 = vcmp.eq.s32.totalorder %v329_v53, %v1698_v8  ;;  %vm453_vm1 = vcmp.eq.s32.totalorder %v329_v53, %v1702_v10  ;;  %vm450_vm2 = vcmp.eq.s32.totalorder %v329_v53, %v1696_v7 }
  0xe5   : >> { %1269 = vmatpush2.msk.msra.mxu0 %vm462_vm6, %v1582_v18  ;;  %1333 = vmatpush2.msk.msra.mxu1 %vm464_vm7, %v1582_v18  ;;  %vm452_vm3 = vcmp.eq.s32.totalorder %v329_v53, %v1700_v9  ;;  %vm447_vm4 = vcmp.eq.s32.totalorder %v326_v54, %v1698_v8  ;;  %vm449_vm5 = vcmp.eq.s32.totalorder %v326_v54, %v1702_v10 }
  0xe6   : >> { %1270 = vmatprep.subr.msk.mxu0 %vm459_vm8, %v1582_v18  ;;  %1334 = vmatprep.subr.msk.mxu1 %vm461_vm9, %v1582_v18  ;;  %vm446_vm6 = vcmp.eq.s32.totalorder %v326_v54, %v1696_v7  ;;  %vm448_vm7 = vcmp.eq.s32.totalorder %v326_v54, %v1700_v9 }
  0xe7   : >> { %1271 = vmatpush2.msk.msra.mxu0 %vm458_vm10, %v1582_v18  ;;  %1335 = vmatpush2.msk.msra.mxu1 %vm460_vm11, %v1582_v18  ;;  %v323_v55 = vpop.permute.xlu0 %322  ;;  %v320_v56 = vpop.permute.xlu1 %319 }
  0xe8   : >> { %1272 = vmatprep.subr.msk.mxu0 %vm455_vm12, %v1582_v18  ;;  %1336 = vmatprep.subr.msk.mxu1 %vm457_vm13, %v1582_v18  ;;  %vm443_vm8 = vcmp.eq.s32.totalorder %v323_v55, %v1698_v8  ;;  %vm445_vm9 = vcmp.eq.s32.totalorder %v323_v55, %v1702_v10  ;;  %vm442_vm10 = vcmp.eq.s32.totalorder %v323_v55, %v1696_v7 }
  0xe9   : >> { %1273 = vmatpush2.msk.msra.mxu0 %vm454_vm14, %v1582_v18  ;;  %1337 = vmatpush2.msk.msra.mxu1 %vm456_vm15, %v1582_v18  ;;  %vm444_vm11 = vcmp.eq.s32.totalorder %v323_v55, %v1700_v9  ;;  %vm439_vm12 = vcmp.eq.s32.totalorder %v320_v56, %v1698_v8  ;;  %vm441_vm13 = vcmp.eq.s32.totalorder %v320_v56, %v1702_v10 }
  0xea   : >> { %1274 = vmatprep.subr.msk.mxu0 %vm451_vm0, %v1582_v18  ;;  %1338 = vmatprep.subr.msk.mxu1 %vm453_vm1, %v1582_v18  ;;  %vm438_vm14 = vcmp.eq.s32.totalorder %v320_v56, %v1696_v7  ;;  %vm440_vm15 = vcmp.eq.s32.totalorder %v320_v56, %v1700_v9 }
  0xeb   : >> { %1275 = vmatpush2.msk.msra.mxu0 %vm450_vm2, %v1582_v18  ;;  %1339 = vmatpush2.msk.msra.mxu1 %vm452_vm3, %v1582_v18  ;;  %v317_v57 = vpop.permute.xlu0 %316  ;;  %v314_v58 = vpop.permute.xlu1 %313 }
  0xec   : >> { %1276 = vmatprep.subr.msk.mxu0 %vm447_vm4, %v1582_v18  ;;  %1340 = vmatprep.subr.msk.mxu1 %vm449_vm5, %v1582_v18  ;;  %vm435_vm0 = vcmp.eq.s32.totalorder %v317_v57, %v1698_v8  ;;  %vm437_vm1 = vcmp.eq.s32.totalorder %v317_v57, %v1702_v10  ;;  %vm434_vm2 = vcmp.eq.s32.totalorder %v317_v57, %v1696_v7 }
  0xed   : >> { %1277 = vmatpush2.msk.msra.mxu0 %vm446_vm6, %v1582_v18  ;;  %1341 = vmatpush2.msk.msra.mxu1 %vm448_vm7, %v1582_v18  ;;  %vm436_vm3 = vcmp.eq.s32.totalorder %v317_v57, %v1700_v9  ;;  %vm431_vm4 = vcmp.eq.s32.totalorder %v314_v58, %v1698_v8  ;;  %vm433_vm5 = vcmp.eq.s32.totalorder %v314_v58, %v1702_v10  ;;  %v739_v57 = vld [vmem:[%s1671_s12 + $0x68] sm:$0xff] }
  0xee   : >> { %1278 = vmatprep.subr.msk.mxu0 %vm443_vm8, %v1582_v18  ;;  %1342 = vmatprep.subr.msk.mxu1 %vm445_vm9, %v1582_v18  ;;  %vm430_vm6 = vcmp.eq.s32.totalorder %v314_v58, %v1696_v7  ;;  %vm432_vm7 = vcmp.eq.s32.totalorder %v314_v58, %v1700_v9  ;;  %v741_v58 = vld [vmem:[%s1671_s12 + $0x78] sm:$0xff] }
  0xef   : >> { %1279 = vmatpush2.msk.msra.mxu0 %vm442_vm10, %v1582_v18  ;;  %1343 = vmatpush2.msk.msra.mxu1 %vm444_vm11, %v1582_v18  ;;  %v311_v59 = vpop.permute.xlu0 %310  ;;  %v308_v60 = vpop.permute.xlu1 %307 }
  0xf0   : >> { %1280 = vmatprep.subr.msk.mxu0 %vm439_vm12, %v1582_v18  ;;  %1344 = vmatprep.subr.msk.mxu1 %vm441_vm13, %v1582_v18  ;;  %vm427_vm8 = vcmp.eq.s32.totalorder %v311_v59, %v1698_v8  ;;  %vm429_vm9 = vcmp.eq.s32.totalorder %v311_v59, %v1702_v10  ;;  %vm426_vm10 = vcmp.eq.s32.totalorder %v311_v59, %v1696_v7 }
  0xf1   : >> { %1281 = vmatpush2.msk.msra.mxu0 %vm438_vm14, %v1582_v18  ;;  %1345 = vmatpush2.msk.msra.mxu1 %vm440_vm15, %v1582_v18  ;;  %vm428_vm11 = vcmp.eq.s32.totalorder %v311_v59, %v1700_v9  ;;  %vm423_vm12 = vcmp.eq.s32.totalorder %v308_v60, %v1698_v8  ;;  %vm425_vm13 = vcmp.eq.s32.totalorder %v308_v60, %v1702_v10 }
  0xf2   : >> { %1282 = vmatprep.subr.msk.mxu0 %vm435_vm0, %v1582_v18  ;;  %1346 = vmatprep.subr.msk.mxu1 %vm437_vm1, %v1582_v18  ;;  %vm422_vm14 = vcmp.eq.s32.totalorder %v308_v60, %v1696_v7  ;;  %vm424_vm15 = vcmp.eq.s32.totalorder %v308_v60, %v1700_v9 }
  0xf3   : >> { %1283 = vmatpush2.msk.msra.mxu0 %vm434_vm2, %v1582_v18  ;;  %1347 = vmatpush2.msk.msra.mxu1 %vm436_vm3, %v1582_v18  ;;  %v305_v61 = vpop.permute.xlu0 %304  ;;  %v302_v62 = vpop.permute.xlu1 %301 }
  0xf4   : >> { %1284 = vmatprep.subr.msk.mxu0 %vm431_vm4, %v1582_v18  ;;  %1348 = vmatprep.subr.msk.mxu1 %vm433_vm5, %v1582_v18  ;;  %vm419_vm0 = vcmp.eq.s32.totalorder %v305_v61, %v1698_v8  ;;  %vm421_vm1 = vcmp.eq.s32.totalorder %v305_v61, %v1702_v10  ;;  %vm418_vm2 = vcmp.eq.s32.totalorder %v305_v61, %v1696_v7 }
  0xf5   : >> { %1285 = vmatpush2.msk.msra.mxu0 %vm430_vm6, %v1582_v18  ;;  %1349 = vmatpush2.msk.msra.mxu1 %vm432_vm7, %v1582_v18  ;;  %vm420_vm3 = vcmp.eq.s32.totalorder %v305_v61, %v1700_v9  ;;  %vm415_vm4 = vcmp.eq.s32.totalorder %v302_v62, %v1698_v8  ;;  %vm417_vm5 = vcmp.eq.s32.totalorder %v302_v62, %v1702_v10 }
  0xf6   : >> { %1286 = vmatprep.subr.msk.mxu0 %vm427_vm8, %v1582_v18  ;;  %1350 = vmatprep.subr.msk.mxu1 %vm429_vm9, %v1582_v18  ;;  %vm414_vm6 = vcmp.eq.s32.totalorder %v302_v62, %v1696_v7  ;;  %vm416_vm7 = vcmp.eq.s32.totalorder %v302_v62, %v1700_v9 }
  0xf7   : >> { %1287 = vmatpush2.msk.msra.mxu0 %vm426_vm10, %v1582_v18  ;;  %1351 = vmatpush2.msk.msra.mxu1 %vm428_vm11, %v1582_v18  ;;  %v299_v63 = vpop.permute.xlu0 %298  ;;  %v296_v0 = vpop.permute.xlu1 %295 }
  0xf8   : >> { %1288 = vmatprep.subr.msk.mxu0 %vm423_vm12, %v1582_v18  ;;  %1352 = vmatprep.subr.msk.mxu1 %vm425_vm13, %v1582_v18  ;;  %vm411_vm8 = vcmp.eq.s32.totalorder %v299_v63, %v1698_v8  ;;  %vm413_vm9 = vcmp.eq.s32.totalorder %v299_v63, %v1702_v10  ;;  %vm410_vm10 = vcmp.eq.s32.totalorder %v299_v63, %v1696_v7 }
  0xf9   : >> { %1289 = vmatpush2.msk.msra.mxu0 %vm422_vm14, %v1582_v18  ;;  %1353 = vmatpush2.msk.msra.mxu1 %vm424_vm15, %v1582_v18  ;;  %vm412_vm11 = vcmp.eq.s32.totalorder %v299_v63, %v1700_v9  ;;  %vm407_vm12 = vcmp.eq.s32.totalorder %v296_v0, %v1698_v8  ;;  %vm409_vm13 = vcmp.eq.s32.totalorder %v296_v0, %v1702_v10 }
  0xfa   : >> { %1290 = vmatprep.subr.msk.mxu0 %vm419_vm0, %v1582_v18  ;;  %1354 = vmatprep.subr.msk.mxu1 %vm421_vm1, %v1582_v18  ;;  %vm406_vm14 = vcmp.eq.s32.totalorder %v296_v0, %v1696_v7  ;;  %vm408_vm15 = vcmp.eq.s32.totalorder %v296_v0, %v1700_v9 }
  0xfb   : >> { %1291 = vmatpush2.msk.msra.mxu0 %vm418_vm2, %v1582_v18  ;;  %1355 = vmatpush2.msk.msra.mxu1 %vm420_vm3, %v1582_v18 }
  0xfc   : >> { %1292 = vmatprep.subr.msk.mxu0 %vm415_vm4, %v1582_v18  ;;  %1356 = vmatprep.subr.msk.mxu1 %vm417_vm5, %v1582_v18 }
  0xfd   : >> { %1293 = vmatpush2.msk.msra.mxu0 %vm414_vm6, %v1582_v18  ;;  %1357 = vmatpush2.msk.msra.mxu1 %vm416_vm7, %v1582_v18 }
  0xfe   : >> { %1294 = vmatprep.subr.msk.mxu0 %vm411_vm8, %v1582_v18  ;;  %1358 = vmatprep.subr.msk.mxu1 %vm413_vm9, %v1582_v18 }
  0xff   : >> { %1295 = vmatpush2.msk.msra.mxu0 %vm410_vm10, %v1582_v18  ;;  %1359 = vmatpush2.msk.msra.mxu1 %vm412_vm11, %v1582_v18 }
 0x100   : >> { %1296 = vmatprep.subr.msk.mxu0 %vm407_vm12, %v1582_v18  ;;  %1360 = vmatprep.subr.msk.mxu1 %vm409_vm13, %v1582_v18 }
 0x101   : >> { %1297 = vmatpush2.msk.msra.mxu0 %vm406_vm14, %v1582_v18  ;;  %1361 = vmatpush2.msk.msra.mxu1 %vm408_vm15, %v1582_v18  ;;  %v728_v18 = vld [vmem:[%s1671_s12 + $0x10] sm:$0xff] }
 0x119   : >> { %v1462_v1 = vpop.trf.xlu0 }
 0x11a   : >> { %v1463_v2 = vunpack.i.l.bf16 %v1462_v1  ;;  %v1466_v3 = vunpack.i.h.bf16 %v1462_v1 }
 0x11c   : >> { %870 = vmatprep.mubr.f32.mxu0 %v1463_v2  ;;  %959 = vmatprep.mubr.f32.mxu1 %v1463_v2 }
 0x11d   : >> { %v1467_v4 = vpop.trf.xlu0  ;;  %871 = vmatmul.mubr.f32.vlgmr.msra.gmra.mxu0 %v1466_v3  ;;  %960 = vmatmul.mubr.f32.vlgmr.msra.gmra.mxu1 %v1466_v3 }
 0x11e   : >> { %v1468_v5 = vunpack.i.l.bf16 %v1467_v4  ;;  %v1471_v6 = vunpack.i.h.bf16 %v1467_v4 }
 0x120   : >> { %876 = vmatprep.mubr.f32.mxu0 %v1468_v5  ;;  %965 = vmatprep.mubr.f32.mxu1 %v1468_v5 }
 0x121   : >> { %v1472_v11 = vpop.trf.xlu0  ;;  %877 = vmatmul.mubr.f32.gmra.mxu0 %v1471_v6  ;;  %966 = vmatmul.mubr.f32.gmra.mxu1 %v1471_v6 }
 0x122   : >> { %v1473_v12 = vunpack.i.l.bf16 %v1472_v11  ;;  %v1476_v13 = vunpack.i.h.bf16 %v1472_v11 }
 0x124   : >> { %882 = vmatprep.mubr.f32.mxu0 %v1473_v12  ;;  %971 = vmatprep.mubr.f32.mxu1 %v1473_v12 }
 0x125   : >> { %v1477_v14 = vpop.trf.xlu0  ;;  %883 = vmatmul.mubr.f32.gmra.mxu0 %v1476_v13  ;;  %972 = vmatmul.mubr.f32.gmra.mxu1 %v1476_v13 }
 0x126   : >> { %v1481_v15 = vunpack.i.h.bf16 %v1477_v14  ;;  %v1478_v16 = vunpack.i.l.bf16 %v1477_v14 }
 0x128   : >> { %888 = vmatprep.mubr.f32.mxu0 %v1478_v16  ;;  %977 = vmatprep.mubr.f32.mxu1 %v1478_v16 }
 0x129   : >> { %889 = vmatmul.mubr.f32.gmra.mxu0 %v1481_v15  ;;  %978 = vmatmul.mubr.f32.gmra.mxu1 %v1481_v15 }
 0x1dd   : >> { %v872_v19 = vpop.f32.mrf.mxu0  ;;  %v961_v20 = vpop.f32.mrf.mxu1 }
 0x1de   : >> { %v984_v23 = vadd.f32 %v872_v19, %v726_v17  ;;  %v986_v24 = vadd.f32 %v961_v20, %v728_v18 }
 0x1df   : >> { %v874_v25 = vpop.f32.mrf.mxu0  ;;  %v963_v26 = vpop.f32.mrf.mxu1 }
 0x1e0   : >> { %1000 = vst [vmem:[%s1671_s12] sm:$0xff] %v984_v23  ;;  %1002 = vst [vmem:[%s1671_s12 + $0x10] sm:$0xff] %v986_v24  ;;  %v985_v29 = vadd.f32 %v874_v25, %v727_v21  ;;  %v987_v30 = vadd.f32 %v963_v26, %v729_v22 }
 0x1e1   : >> { %v878_v31 = vpop.f32.mrf.mxu0  ;;  %v967_v32 = vpop.f32.mrf.mxu1 }
 0x1e2   : >> { %1001 = vst [vmem:[%s1671_s12 + $0x8] sm:$0xff] %v985_v29  ;;  %1003 = vst [vmem:[%s1671_s12 + $0x18] sm:$0xff] %v987_v30  ;;  %v988_v35 = vadd.f32 %v878_v31, %v730_v27  ;;  %v990_v36 = vadd.f32 %v967_v32, %v732_v28 }
 0x1e3   : >> { %v880_v37 = vpop.f32.mrf.mxu0  ;;  %v969_v38 = vpop.f32.mrf.mxu1 }
 0x1e4   : >> { %1004 = vst [vmem:[%s1671_s12 + $0x20] sm:$0xff] %v988_v35  ;;  %1006 = vst [vmem:[%s1671_s12 + $0x30] sm:$0xff] %v990_v36  ;;  %v989_v41 = vadd.f32 %v880_v37, %v731_v33  ;;  %v991_v42 = vadd.f32 %v969_v38, %v733_v34 }
 0x1e5   : >> { %v884_v43 = vpop.f32.mrf.mxu0  ;;  %v973_v44 = vpop.f32.mrf.mxu1 }
 0x1e6   : >> { %1005 = vst [vmem:[%s1671_s12 + $0x28] sm:$0xff] %v989_v41  ;;  %1007 = vst [vmem:[%s1671_s12 + $0x38] sm:$0xff] %v991_v42  ;;  %v992_v47 = vadd.f32 %v884_v43, %v734_v39  ;;  %v994_v48 = vadd.f32 %v973_v44, %v736_v40 }
 0x1e7   : >> { %v886_v49 = vpop.f32.mrf.mxu0  ;;  %v975_v50 = vpop.f32.mrf.mxu1 }
 0x1e8   : >> { %1008 = vst [vmem:[%s1671_s12 + $0x40] sm:$0xff] %v992_v47  ;;  %1010 = vst [vmem:[%s1671_s12 + $0x50] sm:$0xff] %v994_v48  ;;  %v993_v53 = vadd.f32 %v886_v49, %v735_v45  ;;  %v995_v54 = vadd.f32 %v975_v50, %v737_v46 }
 0x1e9   : >> { %v890_v55 = vpop.f32.mrf.mxu0  ;;  %v979_v56 = vpop.f32.mrf.mxu1 }
 0x1ea   : >> { %1009 = vst [vmem:[%s1671_s12 + $0x48] sm:$0xff] %v993_v53  ;;  %1011 = vst [vmem:[%s1671_s12 + $0x58] sm:$0xff] %v995_v54  ;;  %v996_v59 = vadd.f32 %v890_v55, %v738_v51  ;;  %v998_v60 = vadd.f32 %v979_v56, %v740_v52  ;;  %177 = sbr.rel (!%p174_p7) target bundleno = 60 (0x3c), region = 73 }
 0x1eb   : >> { %v892_v61 = vpop.f32.mrf.mxu0  ;;  %v981_v62 = vpop.f32.mrf.mxu1 }
 0x1ec   : >> { %1012 = vst [vmem:[%s1671_s12 + $0x60] sm:$0xff] %v996_v59  ;;  %1014 = vst [vmem:[%s1671_s12 + $0x70] sm:$0xff] %v998_v60  ;;  %v997_v63 = vadd.f32 %v892_v61, %v739_v57  ;;  %v999_v0 = vadd.f32 %v981_v62, %v741_v58 }
 0x1ee   : >> { %1013 = vst [vmem:[%s1671_s12 + $0x68] sm:$0xff] %v997_v63  ;;  %1015 = vst [vmem:[%s1671_s12 + $0x78] sm:$0xff] %v999_v0 }
 0x1ef PF: > { %s2087_s0 = scalar_lea.sflag [#allocation6], %s131_s9  ;;  %1023 = sbr.rel (!%p1655_p1) target bundleno = 528 (0x210), region = 43 }
 0x1f0   : > { %s1363_s28 = sshll.u32 (%p1655_p1), %s1638_s27, 2 }
 0x1f1   : > { %s1025_s30 = ssub.s32 (%p1655_p1), 6, %s1363_s28 }
 0x1f2   : > { %p1026_p8 = scmp.lt.s32.totalorder (%p1655_p1), %s1025_s30, 4 }
 0x1f4   : > { %s2165_s30 = smov (!%p1026_p8, %s1025_s30), 4 }
 0x1f5   : > { %s2095_s5 = sshll.u32 %s2165_s30, 9 }
 0x1f6   : > { %s1030_s10 = ssub.s32 2048, %s2095_s5 }
 0x1f7   : > { %1031 = vsyncadd %s2087_s0, %s1030_s10  ;;  %p1365_p9 = scmp.ne.s32.totalorder %s2095_s5, 0  ;;  %s1372_s7 = sshll.u32 %s1638_s27, 9 }
 0x1f8   : > { %s2104_s13 = scalar_lea.hbm %s2156_s4, %s1372_s7  ;;  %s1367_s14 = sshll.u32 %s2165_s30, 3 }
 0x1f9   : > { %s1037_s15 = sshll.u32 %s1671_s12, 4  ;;  %s1583_s17 = smov [#allocation5]   ;;  %s2108_s15 = int_to_ptr.vmem [resolvable:$true] %s1037_s15 }
 0x1fa   : > { %s1506_s16 = scalar_lea.vmem %s2108_s15, %s2095_s5  ;;  %s1510_s18 = sshll.u32 %s1583_s17, 4  ;;  %s1511_s18 = int_to_ptr.vmem [resolvable:$false] %s1510_s18 }
 0x1fb   : > { %p1507_p10 = scmp.ne.s32.totalorder %s2108_s15, %s1506_s16  ;;  %s1512_s27 = scalar_lea.vmem %s1511_s18, 4096 }
 0x1fc   : > { %p1513_p13 = scmp.lt.s32.totalorder %s2108_s15, %s1511_s18  ;;  %p1514_p0 = scmp.lt.s32.totalorder %s1512_s27, %s1506_s16 }
 0x1fd   : > { %p1508_p11 = pnand %p1507_p10, %p1365_p9 }
 0x1fe   : > { %p1515_p1 = por %p1514_p0, %p1513_p13 }
 0x1ff   : > { %p1509_p12 = pneg %p1508_p11 }
 0x201   : > { %p1516_p3 = pnand %p1515_p1, %p1509_p12 }
 0x203   : > { %1519 = shalt.err (!%p1516_p3)
}
 0x204   : > { %s1520_s12 = scalar_lea.hbm %s2104_s13, %s2095_s5  ;;  %s1524_s21 = scalar_lea.hbm %s2156_s4, 3072 }
 0x205   : > { %p1521_p4 = scmp.ne.s32.totalorder %s2104_s13, %s1520_s12  ;;  %p1525_p7 = scmp.lt.s32.totalorder %s2104_s13, %s2156_s4 }
 0x206   : > { %p1526_p8 = scmp.lt.s32.totalorder %s1524_s21, %s1520_s12 }
 0x207   : > { %p1522_p5 = pnand %p1521_p4, %p1365_p9 }
 0x208   : > { %p1527_p10 = por %p1526_p8, %p1525_p7 }
 0x209   : > { %p1523_p6 = pneg %p1522_p5 }
 0x20b   : > { %p1528_p11 = pnand %p1527_p10, %p1523_p6 }
 0x20d   : > { %1531 = shalt.err (!%p1528_p11)
}
 0x20e   : > { %s1584_s28 = smov 512   ;;  %s1585_s10 = smov 768  }
 0x20f   : > { %1043 = dma.vmem_to_hbm [thread:$0]  (%p1365_p9), %s2108_s15, %s2095_s5, %s2104_s13, %s2087_s0, %s1584_s28, %s1585_s10, %s1367_s14  }
 0x210 PF: > { %p1380_p12 = scmp.ge.s32.totalorder %s1572_s26, 2  ;;  %s1052_s7 = sand.u32 1, %s1560_s1  }
 0x211   : > { %s1053_s9 = scalar_lea.sflag [#allocation6], %s1052_s7 }
 0x212   : > { %p1377_p13 = pnand %p1380_p12, %p1659_p2 }
 0x214   : > { %p1378_p0 = pneg %p1377_p13 }
 0x216   : > { %1555 = dma.done.wait (%p1378_p0), %s1053_s9, 2048  }
 0x217   : > { %1557 = vsyncadd (%p1378_p0), %s1053_s9, 4294965248  ;;  %p24_p1 = scmp.ge.s32.totalorder %s1642_s29, 4   ;;  %s2160_s1 = smov %s1564_s24 }
 0x218   : > { %s2161_s24 = smov %s1568_s25  ;;  %s2162_s25 = smov %s1653_s6 }
 0x219   : > { %s2163_s26 = smov %s1642_s29  ;;  %26 = sbr.rel (!%p24_p1) target bundleno = 28 (0x1c), region = 84 }
 0x21e   :  { %1058 = vsyncpa [#allocation6], 1 }
 0x21f   :  { %1060 = vsyncpa [#allocation6 + $0x1], 1 }

</bundles_post_ra>
